<compile_context>
chip_gen: v7x
topology: tpu7x:2x2x1
jax: 0.10.0
libtpu: 0.0.40
codegen_flags: <defaults>
</compile_context>

<pallas_src>
import functools

import jax
import jax.numpy as jnp
from jax import lax
from jax.experimental import pallas as pl
from jax.experimental.pallas import tpu as pltpu


def _round_up(v, m):
    return ((v + m - 1) // m) * m


def _entropy_kernel(x_ref, o_ref, *, batch, b_tile, hw, hw_tile):
    # x_ref: (b_tile, C, hw_tile) block; o_ref: (1, 1, hw_tile) partial row.
    x = x_ref[...].astype(jnp.float32)               # (b_tile, C, hw_tile)
    m = jnp.max(x, axis=1, keepdims=True)            # (b_tile, 1, hw_tile)
    z = x - m
    e = jnp.exp(z)
    s = jnp.sum(e, axis=1, keepdims=True)            # sum_C e
    w = jnp.sum(e * z, axis=1, keepdims=True)        # sum_C e*z
    # Per-lane entropy: sum_C p*log_p = w/s - log(s).  approx recip -> EUP slot.
    ent = w * pl.reciprocal(s, approx=True) - jnp.log(s)   # (b_tile, 1, hw_tile)

    if batch % b_tile != 0:
        # Ragged last batch block: zero contributions from out-of-range rows
        # (garbage rows may hold NaN/Inf; jnp.where contains them lane-wise).
        bi = pl.program_id(0)
        gb = bi * b_tile + lax.broadcasted_iota(jnp.int32, (b_tile, 1, hw_tile), 0)
        ent = jnp.where(gb < batch, ent, 0.0)

    row = jnp.sum(ent, axis=0, keepdims=True)         # (1, 1, hw_tile)

    if hw % hw_tile != 0:
        # Only the last HW tile has padded lanes; skip the mask elsewhere.
        hi = pl.program_id(1)
        last = pl.num_programs(1) - 1

        @pl.when(hi == last)
        def _():
            g = hi * hw_tile + lax.broadcasted_iota(jnp.int32, (1, 1, hw_tile), 2)
            o_ref[...] = jnp.where(g < hw, row, 0.0)

        @pl.when(hi != last)
        def _():
            o_ref[...] = row
    else:
        o_ref[...] = row


def _vmem_limit_bytes():
    cap = 64 * 1024 * 1024          # conservative fallback: v7x per-TC VMEM
    try:
        cap = int(pltpu.get_tpu_info().vmem_capacity_bytes)
    except Exception:
        pass
    # Leave headroom; never request more than ~100 MiB even on 128 MiB parts.
    return int(min(cap - 8 * 1024 * 1024, 100 * 1024 * 1024))


def entropy(x):
    """x: (B, C, H, W). Returns scalar sum(softmax(x,1) * log_softmax(x,1))."""
    B, C, H, W = x.shape
    HW = H * W
    xr = x.reshape(B, C, HW)

    itemsize = xr.dtype.itemsize
    vmem_limit = _vmem_limit_bytes()
    usable = (vmem_limit * 3) // 4   # keep slack under the explicit limit

    # Per (batch row, lane) column VMEM cost:
    #   2 double-buffered input planes (sublane-padded for the input dtype)
    #   + ~4 live f32 intermediates (x_f32, z, e, e*z; sublane-padded to 8).
    c_pad_in = _round_up(C, max(8, 32 // itemsize))
    c_pad_f32 = _round_up(C, 8)
    bytes_per_col = 2 * c_pad_in * itemsize + 4 * c_pad_f32 * 4

    # Lane tile: multiple of 128 (or the full sub-128 extent), as big as fits.
    if HW >= 128:
        hw_cap = (HW // 128) * 128
        hw_budget = (usable // bytes_per_col // 128) * 128
        hw_tile = int(max(128, min(hw_cap, hw_budget)))
    else:
        hw_tile = HW
    # TODO(synk): for very large C (thousands of channels) stream over C inside
    # the kernel (running m/s/w accumulators) instead of shrinking hw_tile.

    # Batch tile fills the remaining budget; ragged last block masked in-kernel.
    b_tile = int(max(1, min(B, usable // (hw_tile * bytes_per_col))))

    num_b = pl.cdiv(B, b_tile)
    num_hw = pl.cdiv(HW, hw_tile)

    # Ensure a 2-TensorCore chip (v7x) has at least two grid cells to shard.
    if num_b * num_hw < 2:
        if B >= 2:
            b_tile = (B + 1) // 2
            num_b = pl.cdiv(B, b_tile)
        elif hw_tile >= 256:
            hw_tile = _round_up(hw_tile // 2, 128)
            num_hw = pl.cdiv(HW, hw_tile)

    hw_out = num_hw * hw_tile   # lane-padded output extent (padded lanes -> 0)

    kernel = functools.partial(
        _entropy_kernel, batch=B, b_tile=b_tile, hw=HW, hw_tile=hw_tile)

    partials = pl.pallas_call(
        kernel,
        out_shape=jax.ShapeDtypeStruct((num_b, 1, hw_out), jnp.float32),
        grid_spec=pltpu.PrefetchScalarGridSpec(
            num_scalar_prefetch=0,
            grid=(num_b, num_hw),
            in_specs=[pl.BlockSpec((b_tile, C, hw_tile),
                                   lambda bi, hi: (bi, 0, hi))],
            out_specs=pl.BlockSpec((1, 1, hw_tile),
                                   lambda bi, hi: (bi, 0, hi)),
        ),
        compiler_params=pltpu.CompilerParams(
            dimension_semantics=("parallel", "parallel"),
            vmem_limit_bytes=vmem_limit),
    )(xr)

    return jnp.sum(partials)


def entropy_ref(x):
    # Pure-JAX reference matching torch semantics (softmax over dim=1).
    xf = x.astype(jnp.float32)
    p = jax.nn.softmax(xf, axis=1)
    lp = jax.nn.log_softmax(xf, axis=1)
    return jnp.sum(p * lp)


if __name__ == "__main__":
    key = jax.random.PRNGKey(0)
    B, C, H, W = 2, 4, 16, 16
    x = jax.random.normal(key, (B, C, H, W), dtype=jnp.float32)

    got = jax.block_until_ready(entropy(x))
    want = jax.block_until_ready(entropy_ref(x))

    # approx reciprocal slightly loosens per-lane accuracy; relaxed tolerance.
    assert jnp.allclose(got, want, rtol=2e-3, atol=2e-3), (got, want)
    print("KERNEL_OK")
</pallas_src>

<mosaic_0001>
module attributes {stable_mosaic.version = 11 : i64} {
  func.func @_entropy_kernel(%arg0: i32, %arg1: i32, %arg2: memref<1x4x256xf32, #tpu.memory_space<vmem>>, %arg3: memref<1x1x256xf32, #tpu.memory_space<vmem>>) attributes {dimension_semantics = [#tpu.dimension_semantics<parallel>, #tpu.dimension_semantics<parallel>], iteration_bounds = array<i64: 2, 1>, scalar_prefetch = 0 : i64, scratch_operands = 0 : i64, tpu.core_type = #tpu.core_type<tc>, window_params = [{transform_indices = @transform_0, window_bounds = array<i64: 1, 4, 256>}, {transform_indices = @transform_1, window_bounds = array<i64: 1, 1, 256>}]} {
    %c0 = arith.constant 0 : index
    %c0_0 = arith.constant 0 : index
    %c0_1 = arith.constant 0 : index
    %0 = vector.load %arg2[%c0, %c0_0, %c0_1] : memref<1x4x256xf32, #tpu.memory_space<vmem>>, vector<1x4x256xf32>
    %cst = arith.constant dense<0xFF800000> : vector<1x256xf32>
    %1 = vector.multi_reduction <maximumf>, %0, %cst [1] : vector<1x4x256xf32> to vector<1x256xf32>
    %2 = vector.shape_cast %1 : vector<1x256xf32> to vector<1x1x256xf32>
    %3 = vector.broadcast %2 : vector<1x1x256xf32> to vector<1x4x256xf32>
    %4 = arith.subf %0, %3 : vector<1x4x256xf32>
    %5 = math.exp %4 : vector<1x4x256xf32>
    %cst_2 = arith.constant dense<0.000000e+00> : vector<1x256xf32>
    %6 = vector.multi_reduction <add>, %5, %cst_2 [1] : vector<1x4x256xf32> to vector<1x256xf32>
    %7 = vector.shape_cast %6 : vector<1x256xf32> to vector<1x1x256xf32>
    %8 = arith.mulf %5, %4 : vector<1x4x256xf32>
    %cst_3 = arith.constant dense<0.000000e+00> : vector<1x256xf32>
    %9 = vector.multi_reduction <add>, %8, %cst_3 [1] : vector<1x4x256xf32> to vector<1x256xf32>
    %10 = vector.shape_cast %9 : vector<1x256xf32> to vector<1x1x256xf32>
    %11 = tpu.reciprocal %7 {approx = true} : vector<1x1x256xf32> -> vector<1x1x256xf32>
    %12 = arith.mulf %10, %11 : vector<1x1x256xf32>
    %13 = math.log %7 : vector<1x1x256xf32>
    %14 = arith.subf %12, %13 : vector<1x1x256xf32>
    %cst_4 = arith.constant dense<0.000000e+00> : vector<1x256xf32>
    %15 = vector.multi_reduction <add>, %14, %cst_4 [0] : vector<1x1x256xf32> to vector<1x256xf32>
    %16 = vector.shape_cast %15 : vector<1x256xf32> to vector<1x1x256xf32>
    %c0_5 = arith.constant 0 : index
    %c0_6 = arith.constant 0 : index
    %c0_7 = arith.constant 0 : index
    %17 = vector.load %arg3[%c0_5, %c0_6, %c0_7] : memref<1x1x256xf32, #tpu.memory_space<vmem>>, vector<1x1x256xf32>
    tpu.vector_store %arg3[%c0_5, %c0_6, %c0_7], %16 {strides = array<i32>} : memref<1x1x256xf32, #tpu.memory_space<vmem>>, vector<1x1x256xf32>,
    return
  }
  func.func @transform_0(%arg0: i32, %arg1: i32) -> (i32, i32, i32) {
    %c0_i32 = arith.constant 0 : i32
    %c0_i32_0 = arith.constant 0 : i32
    return %arg0, %c0_i32, %arg1 : i32, i32, i32
  }
  func.func @transform_1(%arg0: i32, %arg1: i32) -> (i32, i32, i32) {
    %c0_i32 = arith.constant 0 : i32
    %c0_i32_0 = arith.constant 0 : i32
    return %arg0, %c0_i32, %arg1 : i32, i32, i32
  }
}

</mosaic_0001>

<bundles_post_ra>
// kernel: tpu_custom_call.1
= control target key start
LH: loop header
LB: loop body
LE: loop exit
PB: predicated region body
PF: predicated region fallthrough
CT: control target
= control target key end

     0   :  { %6 = vsyncpa [#allocation3], 0  ;;  %s747_s0 = inlined_call_operand.hbm [shape: f32[2,4,256], index: 0, kind: input, shape index: {}]   ;;  %s748_s1 = inlined_call_operand.hbm [shape: f32[2,1,256], index: 1, kind: output, shape index: {}]  }
   0x1   :  { %8 = vsyncpa [#allocation3 + $0x1], 0 }
   0x2   :  { %9 = vsyncpa [#allocation4], 0 }
   0x3   :  { %11 = vsyncpa [#allocation4 + $0x1], 0  ;;  %s568_s6 = smov 0   ;;  %s570_s7 = smov 0  }
   0x4   :  { %s572_s8 = smov 0   ;;  %s574_s9 = smov 0  }
   0x5   :  { %s576_s10 = smov 0   ;;  %s578_s11 = smov 0  }
   0x6 LB: > { %s350_s12 = sadd.s32 4294967295, %s553_s11   ;;  %s351_s13 = sadd.s32 4294967294, %s553_s11   ;;  %s553_s11 = sphi %s578_s11, %s17_s11   ;;  %s549_s10 = sphi %s576_s10, %s764_s10   ;;  %s545_s9 = sphi %s574_s9, %s763_s9   ;;  %s541_s8 = sphi %s572_s8, %s762_s8   ;;  %s537_s7 = sphi %s570_s7, %s761_s7   ;;  %s533_s6 = sphi %s568_s6, %s760_s6  }
   0x7   : > { %s29_s14 = sadd.s32 1, %s549_s10  ;;  %s38_s15 = sadd.s32 1, %s541_s8 }
   0x8   : > { %p31_p0 = scmp.ge.s32.totalorder %s29_s14, 2  ;;  %p45_p1 = scmp.ne.s32.totalorder %s541_s8, %s537_s7 }
   0x9   : > { %p46_p2 = scmp.eq.s32.totalorder %s553_s11, 0  ;;  %p51_p3 = scmp.ne.s32.totalorder %s537_s7, %s533_s6 }
   0xa   : > { %s766_s14 = smov (%p31_p0, %s29_s14), 0  ;;  %p52_p5 = scmp.eq.s32.totalorder %s350_s12, 0 }
   0xb   : > { %p609_p4 = por %p46_p2, %p45_p1  ;;  %s33_s17 = ssub.s32 %s549_s10, %s766_s14 }
   0xc   : > { %p77_p6 = scmp.eq.s32.totalorder %s350_s12, 1  ;;  %p36_p7 = scmp.eq.s32.totalorder %s33_s17, 0 }
   0xd   : > { %p615_p8 = por %p52_p5, %p51_p3  ;;  %p83_p10 = scmp.eq.s32.totalorder %s351_s13, 1 }
   0xe   : > { %p619_p9 = por %p77_p6, %p45_p1  ;;  %p379_p13 = scmp.lt.s32.totalorder %s553_s11, 2 }
   0xf   : > { %s624_s20 = scalar_select %p36_p7, %s541_s8, %s38_s15  }
  0x10   : > { %s752_s19 = scalar_select %p619_p9, 1, 0 }
  0x11   : > { %p626_p11 = por %p83_p10, %p51_p3  ;;  %s103_s22 = sand.u32 1, %s541_s8  }
  0x12   : > { %s354_s23 = sshll.u32 %s103_s22, 3  ;;  %s365_s24 = sshll.u32 %s549_s10, 7 }
  0x13   : > { %s753_s21 = scalar_select %p626_p11, 1, 0 }
  0x14   : > { %s637_s27 = scalar_lea.hbm %s747_s0, %s365_s24  ;;  %s107_s28 = scalar_lea.vmem [#allocation2], %s354_s23 }
  0x15   : > { %s117_s29 = sshll.u32 %s107_s28, 4  ;;  %p643_p0 = pnand %p379_p13, %p609_p4  ;;  %s639_s29 = int_to_ptr.vmem [resolvable:$true] %s117_s29 }
  0x16   : > { %s104_s2 = scalar_lea.sflag [#allocation3], %s103_s22  ;;  %s441_s3 = scalar_lea.hbm %s637_s27, 128 }
  0x17   : > { %p442_p3 = scmp.ne.s32.totalorder %s637_s27, %s441_s3  ;;  %p443_p5 = pneg %p643_p0 }
  0x18   : > { %s446_s12 = scalar_lea.hbm %s747_s0, 256  ;;  %p447_p4 = scmp.lt.u32.totalorder %s637_s27, %s747_s0 }
  0x19   : > { %p444_p6 = pnand %p443_p5, %p442_p3  ;;  %p448_p10 = scmp.lt.u32.totalorder %s446_s12, %s441_s3 }
  0x1a   : > { %p450_p12 = scmp.lt.u32.totalorder %s441_s3, %s637_s27 }
  0x1b   : > { %p445_p7 = pneg %p444_p6  ;;  %p449_p13 = por %p448_p10, %p447_p4 }
  0x1d   : > { %p451_p1 = por %p450_p12, %p449_p13 }
  0x1f   : > { %p452_p2 = pnand %p451_p1, %p445_p7 }
  0x21   : > { %455 = shalt.err (!%p452_p2)
}
  0x22   : > { %s456_s16 = scalar_lea.vmem %s639_s29, 128  ;;  %s555_s17 = smov [#allocation2]  }
  0x23   : > { %p457_p3 = scmp.ne.s32.totalorder %s639_s29, %s456_s16  ;;  %s461_s22 = sshll.u32 %s555_s17, 4  ;;  %s462_s22 = int_to_ptr.vmem [resolvable:$false] %s461_s22 }
  0x24   : > { %s463_s23 = scalar_lea.vmem %s462_s22, 256  ;;  %p464_p9 = scmp.lt.s32.totalorder %s639_s29, %s462_s22 }
  0x25   : > { %p459_p6 = pnand %p457_p3, %p443_p5  ;;  %p465_p4 = scmp.lt.s32.totalorder %s463_s23, %s456_s16 }
  0x27   : > { %p460_p11 = pneg %p459_p6  ;;  %p466_p10 = por %p465_p4, %p464_p9 }
  0x29   : > { %p467_p12 = pnand %p466_p10, %p460_p11 }
  0x2b   : > { %470 = shalt.err (!%p467_p12)
}
  0x2c   : > { %374 = dma.hbm_to_vmem [thread:$0]  (!%p643_p0), %s637_s27, 128, %s639_s29, %s104_s2  }
  0x2d   : > { %p755_p1 = scmp.lt.s32.totalorder %s553_s11, 3  ;;  %p756_p2 = scmp.ge.s32.totalorder %s553_s11, 1 }
  0x2f   : > { %p123_p5 = pnand %p756_p2, %p755_p1 }
  0x30   : > { %s679_s24 = sand.u32 (!%p123_p5), 1, %s537_s7  }
  0x31   : > { %126 = sbr.rel (%p123_p5) target bundleno = 141 (0x8d), region = 24  ;;  %s358_s25 = sshll.u32 (!%p123_p5), %s679_s24, 3 }
  0x32   : > { %s129_s26 = scalar_lea.sflag (!%p123_p5), [#allocation3], %s679_s24  ;;  %s132_s28 = scalar_lea.vmem (!%p123_p5), [#allocation2], %s358_s25 }
  0x38   : > { %524 = dma.done.wait (%p615_p8), %s129_s26, 128  }
  0x39   : > { %526 = vsyncadd (%p615_p8), %s129_s26, 4294967168  ;;  %vm157_vm0 = vcmask 1043456   ;;  %v153_v0 = vld [vmem:[%s132_s28] sm:$0xff]  ;;  %v556_v50 = vmov 1966171168   ;;  %v232_v52 = vlaneseq  ;;  %s359_s18 = sshll.u32 %s679_s24, 1 }
  0x3a   : > { %v155_v1 = vcombine.high %v153_v0, %v153_v0  ;;  %v158_v2 = vsel %vm157_vm0, %v153_v0, -inf  ;;  %v230_v51 = vunpack.c.l.s4 %v556_v50  ;;  %s150_s27 = scalar_lea.vmem [#allocation5], %s359_s18  ;;  %s366_s30 = sshll.u32 %s545_s9, 5 }
  0x3b   : > { %v159_v3 = vrot.slane %v158_v2, 4  ;;  %v233_v60 = vshrl.u32 %v232_v52, 7  ;;  %s266_s29 = sshll.u32 %s150_s27, 4  ;;  %vm246_vm1 = vcmp.lt.s32.totalorder %v232_v52, 256  ;;  %s700_s4 = scalar_lea.hbm %s748_s1, %s366_s30  ;;  %s695_s29 = int_to_ptr.vmem [resolvable:$true] %s266_s29 }
  0x3c   : > { %v165_v4 = vsel %vm157_vm0, %v155_v1, -inf  ;;  %v231_v59 = vunpack.c.0.s8 %v230_v51  ;;  %s250_s5 = scalar_lea.sflag [#allocation4], %s679_s24  ;;  %s471_s12 = scalar_lea.vmem %s695_s29, 32 }
  0x3d   : > { %v160_v5 = vmax.f32 %v158_v2, %v159_v3  ;;  %v166_v6 = vrot.slane %v165_v4, 4  ;;  %p472_p8 = scmp.ne.s32.totalorder %s695_s29, %s471_s12  ;;  %p757_p9 = scmp.ne.s32.totalorder %s752_s19, 0 }
  0x3e   : > { %v234_v2 = vsub.s32 %v231_v59, %v233_v60  ;;  %s557_s9 = smov [#allocation5]  }
  0x3f   : > { %v161_v7 = vrot.slane %v160_v5, 2  ;;  %v167_v8 = vmax.f32 %v165_v4, %v166_v6  ;;  %p473_p11 = pnand %p472_p8, %p757_p9  ;;  %s475_s13 = sshll.u32 %s557_s9, 4  ;;  %s476_s13 = int_to_ptr.vmem [resolvable:$false] %s475_s13 }
  0x40   : > { %s477_s15 = scalar_lea.vmem %s476_s13, 64  ;;  %p478_p7 = scmp.lt.s32.totalorder %s695_s29, %s476_s13 }
  0x41   : > { %v162_v9 = vmax.f32 %v160_v5, %v161_v7  ;;  %v168_v10 = vrot.slane %v167_v8, 2  ;;  %p474_p0 = pneg %p473_p11  ;;  %p479_p13 = scmp.lt.s32.totalorder %s477_s15, %s471_s12 }
  0x43   : > { %v163_v11 = vrot.slane %v162_v9, 1  ;;  %v169_v12 = vmax.f32 %v167_v8, %v168_v10  ;;  %p480_p3 = por %p479_p13, %p478_p7 }
  0x45   : > { %v164_v13 = vmax.f32 %v162_v9, %v163_v11  ;;  %v170_v14 = vrot.slane %v169_v12, 1  ;;  %p481_p6 = pnand %p480_p3, %p474_p0 }
  0x47   : > { %v171_v15 = vmax.f32 %v169_v12, %v170_v14 }
  0x49   : > { %v174_v16 = vcombine.low %v164_v13, %v171_v15 }
  0x4b   : > { %v176_v17 = vsub.f32 %v153_v0, %v174_v16 }
  0x4d   : > { %v177_v18 = vmul.f32 1.442695, %v176_v17 }
  0x4f   : > { %431 = vpow2.f32 %v177_v18 }
  0x59   : > { %v432_v19 = vpop.eup %431 }
  0x5a   : > { %v196_v20 = vmul.f32 %v432_v19, %v176_v17  ;;  %v180_v21 = vcombine.high %v432_v19, %v432_v19  ;;  %v182_v22 = vsel %vm157_vm0, %v432_v19, 0.0 }
  0x5b   : > { %v183_v23 = vrot.slane %v182_v22, 4 }
  0x5c   : > { %v198_v24 = vcombine.high %v196_v20, %v196_v20  ;;  %v200_v25 = vsel %vm157_vm0, %v196_v20, 0.0  ;;  %v189_v26 = vsel %vm157_vm0, %v180_v21, 0.0 }
  0x5d   : > { %v201_v27 = vrot.slane %v200_v25, 4  ;;  %v184_v28 = vadd.f32 %v183_v23, %v182_v22  ;;  %v190_v29 = vrot.slane %v189_v26, 4 }
  0x5e   : > { %v207_v30 = vsel %vm157_vm0, %v198_v24, 0.0 }
  0x5f   : > { %v185_v31 = vrot.slane %v184_v28, 2  ;;  %v191_v32 = vadd.f32 %v190_v29, %v189_v26  ;;  %v202_v33 = vadd.f32 %v201_v27, %v200_v25  ;;  %v208_v34 = vrot.slane %v207_v30, 4 }
  0x61   : > { %v186_v35 = vadd.f32 %v185_v31, %v184_v28  ;;  %v192_v36 = vrot.slane %v191_v32, 2  ;;  %v209_v37 = vadd.f32 %v208_v34, %v207_v30  ;;  %v203_v38 = vrot.slane %v202_v33, 2 }
  0x63   : > { %v187_v39 = vrot.slane %v186_v35, 1  ;;  %v193_v40 = vadd.f32 %v192_v36, %v191_v32  ;;  %v210_v41 = vrot.slane %v209_v37, 2  ;;  %v204_v44 = vadd.f32 %v203_v38, %v202_v33 }
  0x65   : > { %v188_v42 = vadd.f32 %v187_v39, %v186_v35  ;;  %v194_v43 = vrot.slane %v193_v40, 1  ;;  %v211_v46 = vadd.f32 %v210_v41, %v209_v37  ;;  %v205_v47 = vrot.slane %v204_v44, 1 }
  0x67   : > { %v195_v45 = vadd.f32 %v194_v43, %v193_v40  ;;  %433 = vrcp.f32 %v188_v42  ;;  %v212_v48 = vrot.slane %v211_v46, 1  ;;  %v206_v49 = vadd.f32 %v205_v47, %v204_v44 }
  0x68   : > { %435 = vlog2.f32 %v188_v42 }
  0x69   : > { %437 = vrcp.f32 %v195_v45  ;;  %v213_v53 = vadd.f32 %v212_v48, %v211_v46 }
  0x6a   : > { %439 = vlog2.f32 %v195_v45 }
  0x71   : > { %v434_v54 = vpop.eup %433 }
  0x72   : > { %v436_v55 = vpop.eup %435  ;;  %v216_v56 = vmul.f32 %v434_v54, %v206_v49 }
  0x73   : > { %v438_v57 = vpop.eup %437  ;;  %v219_v58 = vmul.f32 0.6931472, %v436_v55 }
  0x74   : > { %v440_v61 = vpop.eup %439  ;;  %v217_v62 = vmul.f32 %v438_v57, %v213_v53 }
  0x75   : > { %v221_v63 = vmul.f32 0.6931472, %v440_v61  ;;  %v222_v0 = vsub.f32 %v216_v56, %v219_v58 }
  0x77   : > { %v223_v1 = vsub.f32 %v217_v62, %v221_v63 }
  0x79   : > { %v228_v3 = vcombine.low %v222_v0, %v223_v1 }
  0x7b   : > { %v235_v4 = vrot.slane %v228_v3, %v234_v2 }
  0x7d   : > { %v242_v5 = vrot.slane %v235_v4, %v234_v2 }
  0x7f   : > { %248 = vst.msk [vmem:[%s150_s27] sm:$0x3] %vm246_vm1, %v242_v5 }
  0x80   : > { %484 = shalt.err (!%p481_p6)
}
  0x81   : > { %s485_s16 = scalar_lea.hbm %s700_s4, 32  ;;  %s489_s23 = scalar_lea.hbm %s748_s1, 64 }
  0x82   : > { %p486_p4 = scmp.ne.s32.totalorder %s700_s4, %s485_s16  ;;  %p490_p1 = scmp.lt.u32.totalorder %s700_s4, %s748_s1 }
  0x83   : > { %p491_p2 = scmp.lt.u32.totalorder %s489_s23, %s485_s16  ;;  %p493_p8 = scmp.lt.u32.totalorder %s485_s16, %s700_s4 }
  0x84   : > { %p487_p10 = pnand %p486_p4, %p757_p9 }
  0x85   : > { %p492_p5 = por %p491_p2, %p490_p1 }
  0x86   : > { %p488_p12 = pneg %p487_p10 }
  0x87   : > { %p494_p11 = por %p493_p8, %p492_p5 }
  0x89   : > { %p495_p0 = pnand %p494_p11, %p488_p12 }
  0x8b   : > { %498 = shalt.err (!%p495_p0)
}
  0x8c   : > { %369 = dma.vmem_to_hbm [thread:$0]  (%p757_p9), %s695_s29, 32, %s700_s4, %s250_s5  }
  0x8d PF: > { %s278_s26 = sand.u32 1, %s533_s6   ;;  %p758_p7 = scmp.ne.s32.totalorder %s753_s21, 0 }
  0x8e   : > { %p759_p13 = scmp.ge.s32.totalorder %s553_s11, 2  ;;  %s279_s28 = scalar_lea.sflag [#allocation4], %s278_s26 }
  0x90   : > { %p376_p3 = pnand %p759_p13, %p758_p7 }
  0x92   : > { %528 = dma.done.wait (!%p376_p3), %s279_s28, 32  }
  0x93   : > { %530 = vsyncadd (!%p376_p3), %s279_s28, 4294967264  ;;  %s17_s11 = sadd.s32 1, %s553_s11   ;;  %s760_s6 = smov %s537_s7 }
  0x94   : > { %p14_p6 = scmp.ge.s32.totalorder %s17_s11, 4   ;;  %s761_s7 = smov %s541_s8 }
  0x95   : > { %s762_s8 = smov %s624_s20  ;;  %s763_s9 = smov %s549_s10 }
  0x96   : > { %s764_s10 = smov %s766_s14  ;;  %16 = sbr.rel (!%p14_p6) target bundleno = 6 (0x6), region = 69 }
  0x9d   :  { %284 = vsyncpa [#allocation3], 1 }
  0x9e   :  { %286 = vsyncpa [#allocation3 + $0x1], 1 }
  0x9f   :  { %287 = vsyncpa [#allocation4], 1 }
  0xa0   :  { %289 = vsyncpa [#allocation4 + $0x1], 1 }

</bundles_post_ra>
